<compile_context>
chip_gen: v6e
topology: v6e:2x2x1
jax: 0.10.0
libtpu: 0.0.40
codegen_flags: <defaults>
</compile_context>

<pallas_src>
import functools

import jax
import jax.numpy as jnp
from jax.experimental import pallas as pl
from jax.experimental.pallas import tpu as pltpu

_LANE = 128
_SUBLANE = 8
_LN_EPS = 1e-5
_PALLAS_MIN_BATCH = 65  # below this, plain XLA is cheaper than kernel launch


def _round_up(x, m):
    return (x + m - 1) // m * m


def _choose_tm(batch):
    """Batch tile: big (HBM-friendly), 256-multiple (MXU-friendly), and split
    into >= 2 grid steps for large B so v7x's two TensorCores both work."""
    b8 = _round_up(batch, _SUBLANE)
    if b8 <= 256:
        return b8
    half = _round_up((b8 + 1) // 2, 256)
    return min(1024, half)


def _text_head_kernel(inv_n, cls_ref, w_ref, b_ref, g_ref, beta_ref, o_ref):
    # cls arrives as f32 tiles; cast to bf16 in-register (cheap VPU op hidden
    # under the MXU matmul) — avoids a second HBM copy of cls in the wrapper.
    x = cls_ref[...].astype(jnp.bfloat16)
    y = jnp.dot(x, w_ref[...], preferred_element_type=jnp.float32)
    y = y + b_ref[...]

    # LayerNorm over the true feature count (inv_n = 1/nout).  Padded lanes of
    # W and b are exactly zero, so y == 0 there and contributes nothing to
    # sum(y) / sum(y*y); no lane mask or iota is needed.
    mean = jnp.sum(y, axis=-1, keepdims=True) * inv_n
    ex2 = jnp.sum(y * y, axis=-1, keepdims=True) * inv_n
    var = jnp.maximum(ex2 - mean * mean, 0.0)
    y_hat = (y - mean) * jax.lax.rsqrt(var + _LN_EPS)

    # Affine; exp(temp) already folded into gamma/beta.  Their padded lanes are
    # zero, so padded output lanes come out exactly 0 (and are sliced away).
    o_ref[...] = (y_hat * g_ref[...] + beta_ref[...]).astype(o_ref.dtype)


def _xla_head(cls_tok, w, b, gamma, beta, temp):
    """Pure-XLA head (identical math). Used for tiny batches and as reference."""
    y = cls_tok @ w + b
    mean = jnp.mean(y, axis=-1, keepdims=True)
    var = jnp.mean((y - mean) ** 2, axis=-1, keepdims=True)
    y = (y - mean) / jnp.sqrt(var + _LN_EPS)
    y = y * gamma + beta
    return y * jnp.exp(temp[0, 0])


def text_encoder_head(cls_tok, w, b, gamma, beta, temp, *, force_pallas=False):
    B, H = cls_tok.shape
    nout = w.shape[1]

    # For tiny batches the whole op is launch/DMA-setup overhead: use XLA.
    if not force_pallas and B < _PALLAS_MIN_BATCH:
        return _xla_head(cls_tok.astype(jnp.float32), w, b, gamma, beta, temp)

    # Lane-dense feature axis: pad nout up to a multiple of 128 (no more).
    n_pad = _round_up(nout, _LANE)
    tm = _choose_tm(B)
    b_pad = _round_up(_round_up(B, _SUBLANE), tm)

    # Fold exp(temp) into the LayerNorm affine once (outside the per-row math).
    scale = jnp.exp(temp[0, 0])
    g_scaled = gamma * scale
    beta_scaled = beta * scale

    def pad2(x, rows, cols):
        return jnp.pad(x, ((0, rows - x.shape[0]), (0, cols - x.shape[1])))

    # cls stays f32 (cast to bf16 happens in-kernel); only pad rows if needed.
    cls_tok = cls_tok.astype(jnp.float32)
    cls_p = cls_tok if b_pad == B else pad2(cls_tok, b_pad, H)
    # Resident operands: W in bf16, bias/affine in f32.
    w_p = pad2(w, H, n_pad).astype(jnp.bfloat16)
    b_p = pad2(b, 1, n_pad).astype(jnp.float32)
    g_p = pad2(g_scaled, 1, n_pad).astype(jnp.float32)
    beta_p = pad2(beta_scaled, 1, n_pad).astype(jnp.float32)

    # VMEM budget: double-buffered cls/out tiles + resident W/b/gamma/beta
    # (counted once), with 2x headroom, under v7x's 32 MiB scoped default.
    vmem_needed = (
        2 * tm * H * 4          # cls tiles (f32, double-buffered)
        + H * n_pad * 2         # W (bf16, resident)
        + 3 * n_pad * 4         # b / gamma / beta (f32, resident)
        + 2 * tm * n_pad * 2    # out tiles (bf16, double-buffered)
    )
    vmem_limit = int(min(32 * 1024 * 1024, max(4 * 1024 * 1024, 2 * vmem_needed)))

    cost = pl.CostEstimate(
        flops=2 * b_pad * H * n_pad + 10 * b_pad * n_pad,
        transcendentals=b_pad,
        bytes_accessed=(b_pad * H * 4 + H * n_pad * 2 + 3 * n_pad * 4
                        + b_pad * n_pad * 2),
    )

    out_padded = pl.pallas_call(
        functools.partial(_text_head_kernel, 1.0 / nout),
        out_shape=jax.ShapeDtypeStruct((b_pad, n_pad), jnp.bfloat16),
        grid=(b_pad // tm,),
        in_specs=[
            pl.BlockSpec((tm, H), lambda i: (i, 0)),        # cls: pipelined (f32)
            pl.BlockSpec((H, n_pad), lambda i: (0, 0)),     # W: resident (bf16)
            pl.BlockSpec((1, n_pad), lambda i: (0, 0)),     # b
            pl.BlockSpec((1, n_pad), lambda i: (0, 0)),     # gamma * exp(temp)
            pl.BlockSpec((1, n_pad), lambda i: (0, 0)),     # beta  * exp(temp)
        ],
        out_specs=pl.BlockSpec((tm, n_pad), lambda i: (i, 0)),
        compiler_params=pltpu.CompilerParams(
            dimension_semantics=("parallel",),
            vmem_limit_bytes=vmem_limit,
        ),
        cost_estimate=cost,
    )(cls_p, w_p, b_p, g_p, beta_p)

    # Module returns f32; drop to bf16 downstream if the consumer accepts it.
    return out_padded[:B, :nout].astype(jnp.float32)


def text_encoder_forward(input_ids, attention_mask, params):
    """Full TextEncoder.forward with the BERT body stubbed (see TODO above)."""
    # --- stubbed "bert": gather only the CLS-token hidden state [B, 768] ---
    cls_tok = params["tok_emb"][input_ids[:, 0]] + params["pos_emb"][0][None, :]
    del attention_mask  # only consumed inside the (stubbed) BERT body

    # --- Pallas-fused head: Linear -> LayerNorm -> * exp(temp) ---
    return text_encoder_head(
        cls_tok.astype(jnp.float32),
        params["w"], params["b"], params["gamma"], params["beta"], params["temp"],
    )


if __name__ == "__main__":
    B, S, H, NOUT, VOCAB = 2, 8, 768, 32, 100

    key = jax.random.PRNGKey(0)
    k_ids, k_tok, k_pos, k_w, k_b, k_cls = jax.random.split(key, 6)

    # Deterministic example inputs at the module's small shapes.
    input_ids = jax.random.randint(k_ids, (B, S), 0, VOCAB, dtype=jnp.int32)
    attention_mask = jnp.ones((B, S), dtype=jnp.int32)

    # Deterministic parameter init (synthetic — not a checkpoint load).
    params = {
        "tok_emb": 0.02 * jax.random.normal(k_tok, (VOCAB, H), jnp.float32),
        "pos_emb": 0.02 * jax.random.normal(k_pos, (S, H), jnp.float32),
        "w": 0.02 * jax.random.normal(k_w, (H, NOUT), jnp.float32),   # Linear weight^T
        "b": 0.02 * jax.random.normal(k_b, (1, NOUT), jnp.float32),   # Linear bias
        "gamma": jnp.ones((1, NOUT), jnp.float32),                    # LayerNorm weight
        "beta": jnp.zeros((1, NOUT), jnp.float32),                    # LayerNorm bias
        "temp": jnp.full((1, 1), 0.07, jnp.float32),                  # temperature
    }

    # --- Test 1: full forward at B=2 (tiny batch -> XLA fallback path). ---
    out_small = jax.block_until_ready(
        text_encoder_forward(input_ids, attention_mask, params))
    cls_tok = params["tok_emb"][input_ids[:, 0]] + params["pos_emb"][0][None, :]
    ref_small = _xla_head(cls_tok, params["w"], params["b"],
                          params["gamma"], params["beta"], params["temp"])
    assert out_small.shape == (B, NOUT)
    assert jnp.allclose(out_small, ref_small, atol=2e-2, rtol=2e-2), float(
        jnp.max(jnp.abs(out_small - ref_small)))

    # --- Test 2: Pallas kernel forced at B=2 (single tiny tile). ---
    out_forced = jax.block_until_ready(
        text_encoder_head(cls_tok, params["w"], params["b"], params["gamma"],
                          params["beta"], params["temp"], force_pallas=True))
    assert jnp.allclose(out_forced, ref_small, atol=2e-2, rtol=2e-2), float(
        jnp.max(jnp.abs(out_forced - ref_small)))

    # --- Test 3: Pallas kernel at B=300 (not a multiple of the 256-row tile):
    #     exercises >=2 grid steps and the zero-padded partial-batch rows. ---
    B2 = 300
    cls_big = 0.05 * jax.random.normal(k_cls, (B2, H), jnp.float32)
    out_big = jax.block_until_ready(
        text_encoder_head(cls_big, params["w"], params["b"], params["gamma"],
                          params["beta"], params["temp"]))
    ref_big = _xla_head(cls_big, params["w"], params["b"],
                        params["gamma"], params["beta"], params["temp"])
    assert out_big.shape == (B2, NOUT)
    assert jnp.allclose(out_big, ref_big, atol=2e-2, rtol=2e-2), float(
        jnp.max(jnp.abs(out_big - ref_big)))

    print("KERNEL_OK")
</pallas_src>

<mosaic_0001>
module attributes {stable_mosaic.version = 11 : i64} {
  func.func @_text_head_kernel(%arg0: i32, %arg1: memref<8x768xf32, #tpu.memory_space<vmem>>, %arg2: memref<768x128xbf16, #tpu.memory_space<vmem>>, %arg3: memref<1x128xf32, #tpu.memory_space<vmem>>, %arg4: memref<1x128xf32, #tpu.memory_space<vmem>>, %arg5: memref<1x128xf32, #tpu.memory_space<vmem>>, %arg6: memref<8x128xbf16, #tpu.memory_space<vmem>>) attributes {dimension_semantics = [#tpu.dimension_semantics<parallel>], iteration_bounds = array<i64: 1>, scalar_prefetch = 0 : i64, scratch_operands = 0 : i64, tpu.core_type = #tpu.core_type<tc>, window_params = [{transform_indices = @transform_0, window_bounds = array<i64: 8, 768>}, {pipeline_mode = #tpu.pipeline_mode<synchronous>, transform_indices = @transform_1, window_bounds = array<i64: 768, 128>}, {pipeline_mode = #tpu.pipeline_mode<synchronous>, transform_indices = @transform_2, window_bounds = array<i64: 1, 128>}, {pipeline_mode = #tpu.pipeline_mode<synchronous>, transform_indices = @transform_3, window_bounds = array<i64: 1, 128>}, {pipeline_mode = #tpu.pipeline_mode<synchronous>, transform_indices = @transform_4, window_bounds = array<i64: 1, 128>}, {transform_indices = @transform_5, window_bounds = array<i64: 8, 128>}]} {
    %c0 = arith.constant 0 : index
    %c0_0 = arith.constant 0 : index
    %0 = vector.load %arg1[%c0, %c0_0] : memref<8x768xf32, #tpu.memory_space<vmem>>, vector<8x768xf32>
    %1 = arith.truncf %0 : vector<8x768xf32> to vector<8x768xbf16>
    %c0_1 = arith.constant 0 : index
    %c0_2 = arith.constant 0 : index
    %2 = vector.load %arg2[%c0_1, %c0_2] : memref<768x128xbf16, #tpu.memory_space<vmem>>, vector<768x128xbf16>
    %cst = arith.constant dense<0.000000e+00> : vector<8x128xf32>
    %3 = tpu.matmul %1, %2, %cst {dimension_numbers = #tpu.dot_dimension_numbers<[1], [0], [0], [1], [0, 0, 1, 1], [], []>} : vector<8x768xbf16>, vector<768x128xbf16>, vector<8x128xf32> -> vector<8x128xf32>
    %c0_3 = arith.constant 0 : index
    %c0_4 = arith.constant 0 : index
    %4 = vector.load %arg3[%c0_3, %c0_4] : memref<1x128xf32, #tpu.memory_space<vmem>>, vector<1x128xf32>
    %5 = vector.broadcast %4 : vector<1x128xf32> to vector<8x128xf32>
    %6 = arith.addf %3, %5 : vector<8x128xf32>
    %cst_5 = arith.constant dense<0.000000e+00> : vector<8xf32>
    %7 = vector.multi_reduction <add>, %6, %cst_5 [1] : vector<8x128xf32> to vector<8xf32>
    %8 = vector.shape_cast %7 : vector<8xf32> to vector<8x1xf32>
    %cst_6 = arith.constant 3.125000e-02 : f32
    %9 = vector.broadcast %cst_6 : f32 to vector<8x1xf32>
    %10 = arith.mulf %8, %9 : vector<8x1xf32>
    %11 = arith.mulf %6, %6 : vector<8x128xf32>
    %cst_7 = arith.constant dense<0.000000e+00> : vector<8xf32>
    %12 = vector.multi_reduction <add>, %11, %cst_7 [1] : vector<8x128xf32> to vector<8xf32>
    %13 = vector.shape_cast %12 : vector<8xf32> to vector<8x1xf32>
    %cst_8 = arith.constant 3.125000e-02 : f32
    %14 = vector.broadcast %cst_8 : f32 to vector<8x1xf32>
    %15 = arith.mulf %13, %14 : vector<8x1xf32>
    %16 = arith.mulf %10, %10 : vector<8x1xf32>
    %17 = arith.subf %15, %16 : vector<8x1xf32>
    %cst_9 = arith.constant 0.000000e+00 : f32
    %18 = vector.broadcast %cst_9 : f32 to vector<8x1xf32>
    %19 = arith.maximumf %17, %18 : vector<8x1xf32>
    %20 = vector.broadcast %10 : vector<8x1xf32> to vector<8x128xf32>
    %21 = arith.subf %6, %20 : vector<8x128xf32>
    %cst_10 = arith.constant 9.99999974E-6 : f32
    %22 = vector.broadcast %cst_10 : f32 to vector<8x1xf32>
    %23 = arith.addf %19, %22 : vector<8x1xf32>
    %24 = math.rsqrt %23 : vector<8x1xf32>
    %25 = vector.broadcast %24 : vector<8x1xf32> to vector<8x128xf32>
    %26 = arith.mulf %21, %25 : vector<8x128xf32>
    %c0_11 = arith.constant 0 : index
    %c0_12 = arith.constant 0 : index
    %27 = vector.load %arg4[%c0_11, %c0_12] : memref<1x128xf32, #tpu.memory_space<vmem>>, vector<1x128xf32>
    %28 = vector.broadcast %27 : vector<1x128xf32> to vector<8x128xf32>
    %29 = arith.mulf %26, %28 : vector<8x128xf32>
    %c0_13 = arith.constant 0 : index
    %c0_14 = arith.constant 0 : index
    %30 = vector.load %arg5[%c0_13, %c0_14] : memref<1x128xf32, #tpu.memory_space<vmem>>, vector<1x128xf32>
    %31 = vector.broadcast %30 : vector<1x128xf32> to vector<8x128xf32>
    %32 = arith.addf %29, %31 : vector<8x128xf32>
    %33 = arith.truncf %32 : vector<8x128xf32> to vector<8x128xbf16>
    %c0_15 = arith.constant 0 : index
    %c0_16 = arith.constant 0 : index
    %34 = vector.load %arg6[%c0_15, %c0_16] : memref<8x128xbf16, #tpu.memory_space<vmem>>, vector<8x128xbf16>
    tpu.vector_store %arg6[%c0_15, %c0_16], %33 {strides = array<i32>} : memref<8x128xbf16, #tpu.memory_space<vmem>>, vector<8x128xbf16>,
    return
  }
  func.func @transform_0(%arg0: i32) -> (i32, i32) {
    %c0_i32 = arith.constant 0 : i32
    %c0_i32_0 = arith.constant 0 : i32
    return %arg0, %c0_i32 : i32, i32
  }
  func.func @transform_1(%arg0: i32) -> (i32, i32) {
    %c0_i32 = arith.constant 0 : i32
    %c0_i32_0 = arith.constant 0 : i32
    %c0_i32_1 = arith.constant 0 : i32
    return %c0_i32, %c0_i32_0 : i32, i32
  }
  func.func @transform_2(%arg0: i32) -> (i32, i32) {
    %c0_i32 = arith.constant 0 : i32
    %c0_i32_0 = arith.constant 0 : i32
    %c0_i32_1 = arith.constant 0 : i32
    return %c0_i32, %c0_i32_0 : i32, i32
  }
  func.func @transform_3(%arg0: i32) -> (i32, i32) {
    %c0_i32 = arith.constant 0 : i32
    %c0_i32_0 = arith.constant 0 : i32
    %c0_i32_1 = arith.constant 0 : i32
    return %c0_i32, %c0_i32_0 : i32, i32
  }
  func.func @transform_4(%arg0: i32) -> (i32, i32) {
    %c0_i32 = arith.constant 0 : i32
    %c0_i32_0 = arith.constant 0 : i32
    %c0_i32_1 = arith.constant 0 : i32
    return %c0_i32, %c0_i32_0 : i32, i32
  }
  func.func @transform_5(%arg0: i32) -> (i32, i32) {
    %c0_i32 = arith.constant 0 : i32
    %c0_i32_0 = arith.constant 0 : i32
    return %arg0, %c0_i32 : i32, i32
  }
}

</mosaic_0001>

<bundles_post_ra>
// kernel: tpu_custom_call.1
= control target key start
LH: loop header
LB: loop body
LE: loop exit
PB: predicated region body
PF: predicated region fallthrough
CT: control target
= control target key end

     0   :  { %10 = vsyncpa [#allocation3], 0  ;;  %s910_s0 = inlined_call_operand.hbm [shape: f32[8,768], index: 0, kind: input, shape index: {}]   ;;  %s911_s1 = inlined_call_operand.hbm [shape: bf16[768,128], index: 1, kind: input, shape index: {}]   ;;  %s912_s2 = inlined_call_operand.vmem [shape: f32[1,128], index: 2, kind: input, shape index: {}]   ;;  %s913_s3 = inlined_call_operand.vmem [shape: f32[1,128], index: 3, kind: input, shape index: {}]   ;;  %s914_s4 = inlined_call_operand.vmem [shape: f32[1,128], index: 4, kind: input, shape index: {}]   ;;  %s915_s5 = inlined_call_operand.hbm [shape: bf16[8,128], index: 5, kind: output, shape index: {}]  }
   0x1   :  { %11 = vsyncpa [#allocation6], 0 }
   0x2   :  { %12 = vsyncpa [#allocation4], 0  ;;  %s857_s18 = smov [#allocation2]   ;;  %s858_s20 = smov [#allocation5]  }
   0x3   :  { %s19_s19 = sshll.u32 %s857_s18, 4  ;;  %s28_s21 = sshll.u32 %s858_s20, 4  ;;  %s20_s19 = int_to_ptr.vmem [resolvable:$true] %s19_s19  ;;  %s29_s21 = int_to_ptr.vmem [resolvable:$true] %s28_s21 }
   0x4   :  { %s799_s22 = scalar_lea.vmem %s20_s19, 768  ;;  %p804_p1 = scmp.lt.s32.totalorder %s20_s19, %s20_s19 }
   0x5   :  { %p800_p0 = scmp.ne.s32.totalorder %s20_s19, %s799_s22  ;;  %p805_p2 = scmp.lt.s32.totalorder %s799_s22, %s799_s22 }
   0x7   :  { %p806_p3 = por %p805_p2, %p804_p1 }
   0x9   :  { %p807_p4 = pnand %p806_p3, %p800_p0 }
   0xb   :  { %810 = shalt.err (!%p807_p4)
}
   0xc   :  { %22 = dma.hbm_to_vmem [thread:$0]  %s910_s0, 768, %s20_s19, [#allocation3]  }
   0xd   :  { %s819_s25 = scalar_lea.vmem %s29_s21, 6144  ;;  %p824_p6 = scmp.lt.s32.totalorder %s29_s21, %s29_s21 }
   0xe   :  { %p820_p5 = scmp.ne.s32.totalorder %s29_s21, %s819_s25  ;;  %p825_p7 = scmp.lt.s32.totalorder %s819_s25, %s819_s25 }
  0x10   :  { %p826_p8 = por %p825_p7, %p824_p6 }
  0x12   :  { %p827_p9 = pnand %p826_p8, %p820_p5 }
  0x14   :  { %830 = shalt.err (!%p827_p9)
}
  0x15   :  { %s859_s26 = smov 64   ;;  %s860_s27 = smov 4  }
  0x16   :  { %34 = dma.hbm_to_vmem [thread:$0]  %s911_s1, 6144, %s29_s21, [#allocation6], %s859_s26, %s859_s26, %s860_s27  }
  0x17   :  { %851 = dma.done.wait [#allocation3], 768  }
  0x18   :  { %852 = vsyncadd [#allocation3], 4294966528 }
  0x19   :  { %853 = dma.done.wait [#allocation6], 6144  }
  0x1a   :  { %854 = vsyncadd [#allocation6], 4294961152  ;;  %v741_v0 = vld [vmem:[#allocation5 + $0x78] sm:$0xff]   ;;  %v745_v4 = vld [vmem:[#allocation5 + $0x70] sm:$0xff]   ;;  %s861_s8 = smov [#allocation7]  }
  0x1b   :  { %v742_v1 = vld [vmem:[#allocation5 + $0x38] sm:$0xff]   ;;  %670 = vmatprep.subr.bf16.mxu0 %v741_v0  ;;  %v746_v5 = vld [vmem:[#allocation5 + $0x30] sm:$0xff]   ;;  %v749_v8 = vld [vmem:[#allocation5 + $0x68] sm:$0xff]   ;;  %s609_s9 = sshll.u32 %s861_s8, 4  ;;  %s610_s9 = int_to_ptr.vmem [resolvable:$true] %s609_s9 }
  0x1c   :  { %v743_v2 = vld [vmem:[#allocation5 + $0xf8] sm:$0xff]   ;;  %671 = vmatpush3.bf16.msra.mxu0 %v742_v1  ;;  %v747_v6 = vld [vmem:[#allocation5 + $0xf0] sm:$0xff]   ;;  %v750_v9 = vld [vmem:[#allocation5 + $0x28] sm:$0xff]   ;;  %s831_s10 = scalar_lea.vmem %s610_s9, 64  ;;  %p836_p11 = scmp.lt.s32.totalorder %s610_s9, %s610_s9 }
  0x1d   :  { %v744_v3 = vld [vmem:[#allocation5 + $0xb8] sm:$0xff]   ;;  %692 = vmatprep.subr.bf16.mxu1 %v743_v2  ;;  %672 = vmatprep.subr.bf16.mxu0 %v745_v4  ;;  %v748_v7 = vld [vmem:[#allocation5 + $0xb0] sm:$0xff]   ;;  %v751_v10 = vld [vmem:[#allocation5 + $0xe8] sm:$0xff]   ;;  %p832_p10 = scmp.ne.s32.totalorder %s610_s9, %s831_s10  ;;  %p837_p12 = scmp.lt.s32.totalorder %s831_s10, %s831_s10 }
  0x1e   :  { %693 = vmatpush3.bf16.msra.mxu1 %v744_v3  ;;  %v752_v11 = vld [vmem:[#allocation5 + $0xa8] sm:$0xff]   ;;  %v753_v12 = vld [vmem:[#allocation5 + $0x60] sm:$0xff]   ;;  %v757_v16 = vld [vmem:[#allocation5 + $0x58] sm:$0xff]  }
  0x1f   :  { %694 = vmatprep.subr.bf16.mxu1 %v747_v6  ;;  %v754_v13 = vld [vmem:[#allocation5 + $0x20] sm:$0xff]   ;;  %v758_v17 = vld [vmem:[#allocation5 + $0x18] sm:$0xff]   ;;  %v761_v20 = vld [vmem:[#allocation5 + $0x50] sm:$0xff]   ;;  %p838_p13 = por %p837_p12, %p836_p11 }
  0x20   :  { %673 = vmatpush3.bf16.msra.mxu0 %v746_v5  ;;  %v755_v14 = vld [vmem:[#allocation5 + $0xe0] sm:$0xff]   ;;  %v759_v18 = vld [vmem:[#allocation5 + $0xd8] sm:$0xff]   ;;  %v762_v21 = vld [vmem:[#allocation5 + $0x10] sm:$0xff]  }
  0x21   :  { %674 = vmatprep.subr.bf16.mxu0 %v749_v8  ;;  %v756_v15 = vld [vmem:[#allocation5 + $0xa0] sm:$0xff]   ;;  %v760_v19 = vld [vmem:[#allocation5 + $0x98] sm:$0xff]   ;;  %v763_v22 = vld [vmem:[#allocation5 + $0xd0] sm:$0xff]   ;;  %p839_p0 = pnand %p838_p13, %p832_p10 }
  0x22   :  { %695 = vmatpush3.bf16.msra.mxu1 %v748_v7  ;;  %v764_v23 = vld [vmem:[#allocation5 + $0x90] sm:$0xff]   ;;  %v765_v24 = vld [vmem:[#allocation5 + $0x48] sm:$0xff]   ;;  %v769_v28 = vld [vmem:[#allocation5 + $0x40] sm:$0xff]  }
  0x23   :  { %696 = vmatprep.subr.bf16.mxu1 %v751_v10  ;;  %v766_v25 = vld [vmem:[#allocation5 + $0x8] sm:$0xff]   ;;  %v770_v29 = vld [vmem:[#allocation5] sm:$0xff]   ;;  %v49_v31 = vld [vmem:[#allocation2 + $0x8] sm:$0xff] }
  0x24   :  { %675 = vmatpush3.bf16.msra.mxu0 %v750_v9  ;;  %v767_v26 = vld [vmem:[#allocation5 + $0xc8] sm:$0xff]   ;;  %v771_v30 = vld [vmem:[#allocation5 + $0xc0] sm:$0xff]   ;;  %v55_v32 = vpack.c.bf16 %v49_v31, %v49_v31  ;;  %v48_v34 = vld [vmem:[#allocation2] sm:$0xff] }
  0x25   :  { %676 = vmatprep.subr.bf16.mxu0 %v753_v12  ;;  %v768_v27 = vld [vmem:[#allocation5 + $0x88] sm:$0xff]   ;;  %v772_v33 = vld [vmem:[#allocation5 + $0x80] sm:$0xff]   ;;  %v54_v35 = vpack.c.bf16 %v48_v34, %v48_v34  ;;  %v773_v36 = vld [vmem:[#allocation5 + $0x178] sm:$0xff]  }
  0x26   :  { %697 = vmatpush3.bf16.msra.mxu1 %v752_v11  ;;  %v51_v37 = vld [vmem:[#allocation2 + $0x18] sm:$0xff]  ;;  %483 = vmatprep.mubr.bf16.mxu0 %v55_v32  ;;  %v774_v39 = vld [vmem:[#allocation5 + $0x138] sm:$0xff]   ;;  %v50_v40 = vld [vmem:[#allocation2 + $0x10] sm:$0xff] }
  0x27   :  { %698 = vmatprep.subr.bf16.mxu1 %v755_v14  ;;  %v57_v38 = vpack.c.bf16 %v51_v37, %v51_v37  ;;  %v56_v41 = vpack.c.bf16 %v50_v40, %v50_v40  ;;  %v775_v42 = vld [vmem:[#allocation5 + $0x170] sm:$0xff]   ;;  %v777_v44 = vld [vmem:[#allocation5 + $0x168] sm:$0xff]   ;;  %v779_v46 = vld [vmem:[#allocation5 + $0x160] sm:$0xff]  }
  0x28   :  { %677 = vmatpush3.bf16.msra.mxu0 %v754_v13  ;;  %v776_v43 = vld [vmem:[#allocation5 + $0x130] sm:$0xff]   ;;  %v778_v45 = vld [vmem:[#allocation5 + $0x128] sm:$0xff]   ;;  %v780_v47 = vld [vmem:[#allocation5 + $0x120] sm:$0xff]  }
  0x29   :  { %678 = vmatprep.subr.bf16.mxu0 %v757_v16  ;;  %523 = vmatprep.mubr.bf16.mxu1 %v57_v38  ;;  %v781_v48 = vld [vmem:[#allocation5 + $0x158] sm:$0xff]   ;;  %v783_v50 = vld [vmem:[#allocation5 + $0x150] sm:$0xff]   ;;  %v785_v54 = vld [vmem:[#allocation5 + $0x148] sm:$0xff]  }
  0x2a   :  { %699 = vmatpush3.bf16.msra.mxu1 %v756_v15  ;;  %v782_v49 = vld [vmem:[#allocation5 + $0x118] sm:$0xff]   ;;  %v784_v53 = vld [vmem:[#allocation5 + $0x110] sm:$0xff]   ;;  %v786_v55 = vld [vmem:[#allocation5 + $0x108] sm:$0xff]  }
  0x2b   :  { %700 = vmatprep.subr.bf16.mxu1 %v759_v18  ;;  %v53_v51 = vld [vmem:[#allocation2 + $0x28] sm:$0xff]  ;;  %v787_v56 = vld [vmem:[#allocation5 + $0x140] sm:$0xff]   ;;  %v52_v58 = vld [vmem:[#allocation2 + $0x20] sm:$0xff] }
  0x2c   :  { %679 = vmatpush3.bf16.msra.mxu0 %v758_v17  ;;  %v59_v52 = vpack.c.bf16 %v53_v51, %v53_v51  ;;  %v788_v57 = vld [vmem:[#allocation5 + $0x100] sm:$0xff]   ;;  %v58_v59 = vpack.c.bf16 %v52_v58, %v52_v58  ;;  %v619_v5 = vld [vmem:[%s912_s2] ss:$0 sm:$0xff] }
  0x2d   :  { %680 = vmatprep.subr.bf16.mxu0 %v761_v20 }
  0x2e   :  { %701 = vmatpush3.bf16.msra.mxu1 %v760_v19 }
  0x2f   :  { %702 = vmatprep.subr.bf16.mxu1 %v763_v22 }
  0x30   :  { %681 = vmatpush3.bf16.msra.mxu0 %v762_v21 }
  0x31   :  { %682 = vmatprep.subr.bf16.mxu0 %v765_v24 }
  0x32   :  { %703 = vmatpush3.bf16.msra.mxu1 %v764_v23 }
  0x33   :  { %704 = vmatprep.subr.bf16.mxu1 %v767_v26  ;;  %v668_v26 = vld [vmem:[%s913_s3] ss:$0 sm:$0xff] }
  0x34   :  { %683 = vmatpush3.bf16.msra.mxu0 %v766_v25 }
  0x35   :  { %684 = vmatprep.subr.bf16.mxu0 %v769_v28  ;;  %v669_v28 = vld [vmem:[%s914_s4] ss:$0 sm:$0xff] }
  0x36   :  { %705 = vmatpush3.bf16.msra.mxu1 %v768_v27 }
  0x37   :  { %706 = vmatprep.subr.bf16.mxu1 %v771_v30 }
  0x38   :  { %685 = vmatpush3.bf16.msra.mxu0 %v770_v29 }
  0x39   :  { %714 = vmatprep.subr.bf16.mxu0 %v773_v36 }
  0x3a   :  { %707 = vmatpush3.bf16.msra.mxu1 %v772_v33 }
  0x3b   :  { %484 = vmatmul.mubr.bf16.vlgmr.msra.gmra.mxu0 %v54_v35 }
  0x3c   :  { %715 = vmatpush3.bf16.msra.mxu0 %v774_v39  ;;  %563 = vmatprep.mubr.bf16.mxu0 %v59_v52 }
  0x3d   :  { %524 = vmatmul.mubr.bf16.vlgmr.msra.gmra.mxu1 %v56_v41  ;;  %716 = vmatprep.subr.bf16.mxu0 %v775_v42 }
  0x40   :  { %717 = vmatpush3.bf16.msra.mxu0 %v776_v43 }
  0x41   :  { %718 = vmatprep.subr.bf16.mxu0 %v777_v44 }
  0x44   :  { %719 = vmatpush3.bf16.msra.mxu0 %v778_v45 }
  0x45   :  { %720 = vmatprep.subr.bf16.mxu0 %v779_v46 }
  0x48   :  { %721 = vmatpush3.bf16.msra.mxu0 %v780_v47 }
  0x49   :  { %722 = vmatprep.subr.bf16.mxu0 %v781_v48 }
  0x4c   :  { %723 = vmatpush3.bf16.msra.mxu0 %v782_v49 }
  0x4d   :  { %724 = vmatprep.subr.bf16.mxu0 %v783_v50 }
  0x50   :  { %725 = vmatpush3.bf16.msra.mxu0 %v784_v53 }
  0x51   :  { %726 = vmatprep.subr.bf16.mxu0 %v785_v54 }
  0x54   :  { %727 = vmatpush3.bf16.msra.mxu0 %v786_v55 }
  0x55   :  { %728 = vmatprep.subr.bf16.mxu0 %v787_v56 }
  0x58   :  { %729 = vmatpush3.bf16.msra.mxu0 %v788_v57 }
  0x5b   :  { %564 = vmatmul.mubr.bf16.vlgmr.msra.gmra.mxu0 %v58_v59 }
  0xfb   :  { %v686_v60 = vpop.f32.mrf.mxu0 }
  0xfd   :  { %v687_v61 = vpop.f32.mrf.mxu0  ;;  %v708_v62 = vpop.f32.mrf.mxu1 }
  0xfe   :  { %v688_v4 = vadd.f32 %v687_v61, %v686_v60 }
  0xff   :  { %v689_v63 = vpop.f32.mrf.mxu0  ;;  %v709_v0 = vpop.f32.mrf.mxu1 }
 0x100   :  { %v486_v6 = vadd.f32 %v688_v4, %v619_v5  ;;  %v710_v7 = vadd.f32 %v709_v0, %v708_v62 }
 0x101   :  { %v690_v1 = vpop.f32.mrf.mxu0  ;;  %v711_v2 = vpop.f32.mrf.mxu1 }
 0x102   :  { %v526_v10 = vadd.f32 %v710_v7, %v486_v6 }
 0x103   :  { %v712_v3 = vpop.f32.mrf.mxu1 }
 0x11b   :  { %v730_v8 = vpop.f32.mrf.mxu0 }
 0x11d   :  { %v731_v9 = vpop.f32.mrf.mxu0 }
 0x11e   :  { %v732_v11 = vadd.f32 %v731_v9, %v730_v8 }
 0x11f   :  { %v733_v12 = vpop.f32.mrf.mxu0 }
 0x120   :  { %v566_v13 = vadd.f32 %v732_v11, %v526_v10 }
 0x121   :  { %v734_v14 = vpop.f32.mrf.mxu0 }
 0x122   :  { %571 = vadd.xlane.f32.xlu0 %v566_v13  ;;  %v574_v15 = vmul.f32 %v566_v13, %v566_v13 }
 0x126   :  { %575 = vadd.xlane.f32.xlu0 %v574_v15 }
 0x1ab   :  { %v572_v16 = vpop.xlane.xlu0 %571 }
 0x1ac   :  { %v573_v17 = vmul.f32 0.03125, %v572_v16 }
 0x1ae   :  { %v578_v19 = vmul.f32 %v573_v17, %v573_v17  ;;  %v581_v24 = vsub.f32 %v566_v13, %v573_v17 }
 0x1af   :  { %v576_v18 = vpop.xlane.xlu0 %575 }
 0x1b0   :  { %v577_v20 = vmul.f32 0.03125, %v576_v18 }
 0x1b2   :  { %v579_v21 = vsub.f32 %v577_v20, %v578_v19 }
 0x1b4   :  { %v580_v22 = vmax.f32 %v579_v21, 0.0 }
 0x1b6   :  { %v582_v23 = vadd.f32 1e-05, %v580_v22 }
 0x1b8   :  { %789 = vrsqrt.f32 %v582_v23 }
 0x1c5   :  { %v790_v25 = vpop.eup %789 }
 0x1c6   :  { %v584_v27 = vmul.f32 %v790_v25, %v581_v24 }
 0x1c8   :  { %v592_v29 = vmul.f32 %v668_v26, %v584_v27 }
 0x1ca   :  { %v600_v30 = vadd.f32 %v669_v28, %v592_v29 }
 0x1cc   :  { %v601_v31 = vpack.c.bf16 %v600_v30, %v600_v30 }
 0x1ce   :  { %602 = vst [vmem:[#allocation7] sm:$0xf] %v601_v31 }
 0x1cf   :  { %842 = shalt.err (!%p839_p0)
}
 0x1d0   :  { %612 = dma.vmem_to_hbm [thread:$0]  %s610_s9, 64, %s915_s5, [#allocation4]  }
 0x1d1   :  { %855 = dma.done.wait [#allocation4], 64  }
 0x1d2   :  { %856 = vsyncadd [#allocation4], 4294967232 }
 0x1d3   :  { %616 = vsyncpa [#allocation3], 1 }
 0x1d4   :  { %617 = vsyncpa [#allocation6], 1 }
 0x1d5   :  { %618 = vsyncpa [#allocation4], 1 }

</bundles_post_ra>
